<compile_context>
chip_gen: v5e
topology: v5e:2x2
jax: 0.10.0
libtpu: 0.0.40
codegen_flags: <defaults>
</compile_context>

<pallas_src>
import math

import jax
import jax.numpy as jnp
from jax import lax
from jax.experimental import pallas as pl
from jax.experimental.pallas import tpu as pltpu

_MIB = 1024 * 1024


# --------------------------------------------------------------------------
# Kernels
# --------------------------------------------------------------------------
def _probe_kernel(x_ref, w_ref, b_ref, o_ref):
    # x_ref: [TB, D] (bf16), w_ref: [4, D] (bf16, lane-dense, PyTorch layout),
    # b_ref: [1, 4] f32, o_ref: [TB, 4] f32
    logits = lax.dot_general(
        x_ref[...], w_ref[...],
        dimension_numbers=(((1,), (1,)), ((), ())),   # contract over D
        preferred_element_type=jnp.float32,
    )
    o_ref[...] = jax.nn.sigmoid(logits + b_ref[...]).astype(o_ref.dtype)


def _probe_kernel_ktiled(x_ref, w_ref, b_ref, o_ref, acc_ref):
    # x_ref: [TB, TK], w_ref: [4, TK], b_ref: [1, 4], o_ref: [TB, 4],
    # acc_ref: [TB, 4] f32 scratch (persists across the K grid axis)
    k = pl.program_id(1)

    @pl.when(k == 0)
    def _():
        acc_ref[...] = jnp.zeros_like(acc_ref)

    acc_ref[...] += lax.dot_general(
        x_ref[...], w_ref[...],
        dimension_numbers=(((1,), (1,)), ((), ())),
        preferred_element_type=jnp.float32,
    )

    @pl.when(k == pl.num_programs(1) - 1)
    def _():
        o_ref[...] = jax.nn.sigmoid(acc_ref[...] + b_ref[...]).astype(o_ref.dtype)


# --------------------------------------------------------------------------
# One-time parameter layout conversion (outside the hot path)
# --------------------------------------------------------------------------
def prepare_params(weight, bias, *, stream_dtype=jnp.bfloat16):
    """PyTorch nn.Linear params -> kernel layout.

    weight: [4, D] (PyTorch layout) -> kept lane-dense [4, D], cast to bf16.
    bias:   [4]                      -> [1, 4] f32 (bias/sigmoid stay f32).
    """
    return (jnp.asarray(weight, stream_dtype),
            jnp.asarray(bias, jnp.float32).reshape(1, -1))


# --------------------------------------------------------------------------
# Tiling / VMEM planning helpers
# --------------------------------------------------------------------------
def _round_up(v, m):
    return ((v + m - 1) // m) * m


def _vmem_capacity_bytes():
    try:
        return int(pltpu.get_tpu_info().vmem_capacity_bytes)
    except Exception:
        return 64 * _MIB   # conservative default (v7x per-TensorCore)


def _padded_vmem_bytes(rows, cols, dtype):
    # Real VMEM footprint: sublane-padded (8 f32 / 16 bf16) x 128-lane padded.
    itemsize = jnp.dtype(dtype).itemsize
    sublane = 8 * max(1, 4 // itemsize)
    return _round_up(max(rows, 1), sublane) * _round_up(max(cols, 1), 128) * itemsize


def _plan_tiling(B, D, x_itemsize, vmem_cap, force_k_tiling, tk_override):
    """Returns (tb, tk). tk is None for the full-D (non K-tiled) path."""
    budget = int(0.40 * vmem_cap)            # double-buffered x-stream budget
    # Batch tile target: as big as possible, but keep >=2-4 grid steps for DMA
    # overlap / v7x core sharding, never below the ~512-row roofline knee.
    tb_target = _round_up(max(pl.cdiv(B, 4), 512), 16)
    tb_full = ((budget // (2 * D * x_itemsize)) // 16) * 16

    if not force_k_tiling and tb_full >= min(256, B):
        tb = min(tb_full, tb_target)
        tb = B if tb >= B else max(tb, 16)
        return tb, None

    # K-tiled fallback for very large D: keep batch tiles big, split D.
    tb = min(tb_target, 1024)
    tb = B if tb >= B else max(tb, 16)
    if tk_override is not None:
        tk = _round_up(int(tk_override), 128)
    else:
        tk_max = max(((budget // (2 * tb * x_itemsize)) // 128) * 128, 128)
        n_k = pl.cdiv(D, tk_max)
        tk = _round_up(pl.cdiv(D, n_k), 128)   # minimize zero padding
    tk = min(tk, _round_up(D, 128))
    return tb, tk


# --------------------------------------------------------------------------
# Forward pass
# --------------------------------------------------------------------------
def legal_action_probe(x_nchw, weight_ld, bias_row, *,
                       force_k_tiling=False, tk=None):
    """Forward pass of LegalActionProbe.

    x_nchw:    [B, C, H, W] (any float dtype; cast once to the stream dtype)
    weight_ld: [4, D] lane-dense weight from prepare_params (bf16), D = C*H*W
    bias_row:  [1, 4] f32
    returns:   [B, 4] f32 sigmoid probabilities
    """
    B = x_nchw.shape[0]
    D = math.prod(x_nchw.shape[1:])            # static Python int
    n_out = weight_ld.shape[0]
    stream_dtype = weight_ld.dtype             # bf16 from prepare_params
    x_itemsize = jnp.dtype(stream_dtype).itemsize

    # flatten(start_dim=1) + one-time cast to the streaming dtype.  Passing a
    # bf16 x from upstream makes the astype a no-op (best case for bandwidth).
    x_flat = x_nchw.reshape(B, D).astype(stream_dtype)

    vmem_cap = _vmem_capacity_bytes()
    tb, tk_plan = _plan_tiling(B, D, x_itemsize, vmem_cap, force_k_tiling, tk)

    x_call, w_call = x_flat, weight_ld

    if tk_plan is None:
        # ---- full-D path: one grid axis over batch tiles -------------------
        grid = (pl.cdiv(B, tb),)
        in_specs = [
            pl.BlockSpec((tb, D), lambda i: (i, 0)),          # streamed x
            pl.BlockSpec((n_out, D), lambda i: (0, 0)),       # resident W (lane-dense)
            pl.BlockSpec((1, n_out), lambda i: (0, 0)),       # resident bias
        ]
        out_specs = pl.BlockSpec((tb, n_out), lambda i: (i, 0))
        scratch_shapes = []
        kernel = _probe_kernel
        reduce_sems = ()
        vmem_needed = (
            2 * _padded_vmem_bytes(tb, D, stream_dtype)          # x double buffer
            + 2 * _padded_vmem_bytes(n_out, D, stream_dtype)     # weight
            + 2 * _padded_vmem_bytes(1, n_out, jnp.float32)      # bias
            + 2 * _padded_vmem_bytes(tb, n_out, jnp.float32)     # out
            + 4 * _MIB                                           # headroom
        )
    else:
        # ---- K-tiled path: grid=(batch tiles, K tiles) ----------------------
        tk_ = tk_plan
        n_k = pl.cdiv(D, tk_)
        d_pad = n_k * tk_
        if d_pad != D:
            # Zero-pad the reduction dim so partial K blocks never read garbage
            # (zeros contribute nothing to the linear output).
            x_call = jnp.pad(x_flat, ((0, 0), (0, d_pad - D)))
            w_call = jnp.pad(weight_ld, ((0, 0), (0, d_pad - D)))
        grid = (pl.cdiv(B, tb), n_k)
        in_specs = [
            pl.BlockSpec((tb, tk_), lambda i, k: (i, k)),
            pl.BlockSpec((n_out, tk_), lambda i, k: (0, k)),
            pl.BlockSpec((1, n_out), lambda i, k: (0, 0)),
        ]
        out_specs = pl.BlockSpec((tb, n_out), lambda i, k: (i, 0))
        scratch_shapes = [pltpu.VMEM((tb, n_out), jnp.float32)]
        kernel = _probe_kernel_ktiled
        reduce_sems = (pltpu.ARBITRARY,)
        vmem_needed = (
            2 * _padded_vmem_bytes(tb, tk_, stream_dtype)
            + 2 * _padded_vmem_bytes(n_out, tk_, stream_dtype)
            + 2 * _padded_vmem_bytes(1, n_out, jnp.float32)
            + 2 * _padded_vmem_bytes(tb, n_out, jnp.float32)
            + _padded_vmem_bytes(tb, n_out, jnp.float32)         # accumulator
            + 4 * _MIB
        )

    # VMEM limit: lift the scoped default, but leave physical headroom (v7x has
    # only 64 MiB per TensorCore -- never hand the compiler all of it).
    headroom = min(16 * _MIB, vmem_cap // 4)
    vmem_limit = int(min(max(vmem_needed, 32 * _MIB), vmem_cap - headroom))
    vmem_limit = max(vmem_limit, 16 * _MIB)

    cost = pl.CostEstimate(
        flops=2 * B * D * n_out,
        transcendentals=B * n_out,
        bytes_accessed=(B * D + n_out * D) * x_itemsize + (B + 1) * n_out * 4,
    )

    out_shape = jax.ShapeDtypeStruct((B, n_out), jnp.float32)

    def run(batch_sem):
        return pl.pallas_call(
            kernel,
            out_shape=out_shape,
            grid_spec=pltpu.PrefetchScalarGridSpec(
                num_scalar_prefetch=0,
                grid=grid,
                in_specs=in_specs,
                out_specs=out_specs,
                scratch_shapes=scratch_shapes,
            ),
            compiler_params=pltpu.CompilerParams(
                dimension_semantics=(batch_sem,) + reduce_sems,
                vmem_limit_bytes=vmem_limit,
            ),
            cost_estimate=cost,
        )(x_call, w_call, bias_row)

    # Only CORE_PARALLEL actually shards the batch grid axis across v7x's two
    # TensorCores ("parallel" is a measured near no-op).  Attempt it whenever
    # there are >=2 batch steps; fall back if this chip/toolchain rejects it.
    if grid[0] >= 2:
        try:
            return run(pltpu.CORE_PARALLEL)
        except Exception:
            pass
    return run(pltpu.PARALLEL)


# --------------------------------------------------------------------------
# Reference + self-test
# --------------------------------------------------------------------------
def _reference(x_nchw, weight, bias):
    B = x_nchw.shape[0]
    return jax.nn.sigmoid(x_nchw.reshape(B, -1) @ weight.T + bias)


if __name__ == "__main__":
    key = jax.random.PRNGKey(0)
    k_x, k_w, k_b = jax.random.split(key, 3)

    # Small shapes consistent with the module: batch=2, channels=4, spatial=16
    B, C, H, W = 2, 4, 16, 16
    D = C * H * W   # in_size = 1024

    x = jax.random.normal(k_x, (B, C, H, W), dtype=jnp.float32)

    # Deterministic init mimicking nn.Linear default: U(-1/sqrt(D), 1/sqrt(D))
    bound = 1.0 / math.sqrt(D)
    weight = jax.random.uniform(k_w, (4, D), minval=-bound, maxval=bound,
                                dtype=jnp.float32)
    bias = jax.random.uniform(k_b, (4,), minval=-bound, maxval=bound,
                              dtype=jnp.float32)

    # One-time param layout conversion (outside the hot path).
    weight_ld, bias_row = prepare_params(weight, bias)

    out = jax.block_until_ready(legal_action_probe(x, weight_ld, bias_row))
    assert out.shape == (B, 4)

    # Loose check vs the pure-f32 reference (bf16 streaming introduces ~1e-3
    # logit error), tight check vs a reference on the same bf16-cast inputs.
    ref_f32 = _reference(x, weight, bias)
    assert jnp.allclose(out, ref_f32, atol=2e-2), "mismatch vs f32 reference"
    ref_bf16 = _reference(x.astype(jnp.bfloat16).astype(jnp.float32),
                          weight.astype(jnp.bfloat16).astype(jnp.float32), bias)
    assert jnp.allclose(out, ref_bf16, atol=2e-3), "mismatch vs bf16-cast reference"

    # Exercise the K-tiled large-D fallback at small shapes (forced tk=256).
    out_k = jax.block_until_ready(
        legal_action_probe(x, weight_ld, bias_row, force_k_tiling=True, tk=256))
    assert jnp.allclose(out_k, out, atol=1e-4), "K-tiled path mismatch"

    print("KERNEL_OK")
</pallas_src>

<mosaic_0001>
module attributes {stable_mosaic.version = 11 : i64} {
  func.func @_probe_kernel(%arg0: i32, %arg1: memref<2x1024xbf16, #tpu.memory_space<vmem>>, %arg2: memref<4x1024xbf16, #tpu.memory_space<vmem>>, %arg3: memref<1x4xf32, #tpu.memory_space<vmem>>, %arg4: memref<2x4xf32, #tpu.memory_space<vmem>>) attributes {dimension_semantics = [#tpu.dimension_semantics<parallel>], iteration_bounds = array<i64: 1>, scalar_prefetch = 0 : i64, scratch_operands = 0 : i64, tpu.core_type = #tpu.core_type<tc>, window_params = [{transform_indices = @transform_0, window_bounds = array<i64: 2, 1024>}, {pipeline_mode = #tpu.pipeline_mode<synchronous>, transform_indices = @transform_1, window_bounds = array<i64: 4, 1024>}, {pipeline_mode = #tpu.pipeline_mode<synchronous>, transform_indices = @transform_2, window_bounds = array<i64: 1, 4>}, {transform_indices = @transform_3, window_bounds = array<i64: 2, 4>}]} {
    %c0 = arith.constant 0 : index
    %c0_0 = arith.constant 0 : index
    %0 = vector.load %arg1[%c0, %c0_0] : memref<2x1024xbf16, #tpu.memory_space<vmem>>, vector<2x1024xbf16>
    %c0_1 = arith.constant 0 : index
    %c0_2 = arith.constant 0 : index
    %1 = vector.load %arg2[%c0_1, %c0_2] : memref<4x1024xbf16, #tpu.memory_space<vmem>>, vector<4x1024xbf16>
    %cst = arith.constant dense<0.000000e+00> : vector<2x4xf32>
    %2 = tpu.matmul %0, %1, %cst {dimension_numbers = #tpu.dot_dimension_numbers<[1], [1], [0], [0], [0, 0, 1, 0], [], []>} : vector<2x1024xbf16>, vector<4x1024xbf16>, vector<2x4xf32> -> vector<2x4xf32>
    %c0_3 = arith.constant 0 : index
    %c0_4 = arith.constant 0 : index
    %3 = vector.load %arg3[%c0_3, %c0_4] : memref<1x4xf32, #tpu.memory_space<vmem>>, vector<1x4xf32>
    %4 = vector.broadcast %3 : vector<1x4xf32> to vector<2x4xf32>
    %5 = arith.addf %2, %4 : vector<2x4xf32>
    %6 = arith.negf %5 : vector<2x4xf32>
    %7 = math.exp %6 : vector<2x4xf32>
    %cst_5 = arith.constant 1.000000e+00 : f32
    %8 = vector.broadcast %cst_5 : f32 to vector<2x4xf32>
    %9 = arith.addf %8, %7 : vector<2x4xf32>
    %10 = arith.divf %8, %9 : vector<2x4xf32>
    %c0_6 = arith.constant 0 : index
    %c0_7 = arith.constant 0 : index
    %11 = vector.load %arg4[%c0_6, %c0_7] : memref<2x4xf32, #tpu.memory_space<vmem>>, vector<2x4xf32>
    tpu.vector_store %arg4[%c0_6, %c0_7], %10 {strides = array<i32>} : memref<2x4xf32, #tpu.memory_space<vmem>>, vector<2x4xf32>,
    return
  }
  func.func @transform_0(%arg0: i32) -> (i32, i32) {
    %c0_i32 = arith.constant 0 : i32
    %c0_i32_0 = arith.constant 0 : i32
    return %arg0, %c0_i32 : i32, i32
  }
  func.func @transform_1(%arg0: i32) -> (i32, i32) {
    %c0_i32 = arith.constant 0 : i32
    %c0_i32_0 = arith.constant 0 : i32
    %c0_i32_1 = arith.constant 0 : i32
    return %c0_i32, %c0_i32_0 : i32, i32
  }
  func.func @transform_2(%arg0: i32) -> (i32, i32) {
    %c0_i32 = arith.constant 0 : i32
    %c0_i32_0 = arith.constant 0 : i32
    %c0_i32_1 = arith.constant 0 : i32
    return %c0_i32, %c0_i32_0 : i32, i32
  }
  func.func @transform_3(%arg0: i32) -> (i32, i32) {
    %c0_i32 = arith.constant 0 : i32
    %c0_i32_0 = arith.constant 0 : i32
    return %arg0, %c0_i32 : i32, i32
  }
}

</mosaic_0001>

<bundles_post_ra>
// kernel: tpu_custom_call.1
= control target key start
LH: loop header
LB: loop body
LE: loop exit
PB: predicated region body
PF: predicated region fallthrough
CT: control target
= control target key end

     0   :  { %8 = vsyncpa [#allocation3], 0  ;;  %s355_s0 = inlined_call_operand.hbm [shape: bf16[2,1024], index: 0, kind: input, shape index: {}]   ;;  %s356_s1 = inlined_call_operand.hbm [shape: bf16[4,1024], index: 1, kind: input, shape index: {}]   ;;  %s357_s2 = inlined_call_operand.vmem [shape: f32[1,4], index: 2, kind: input, shape index: {}]   ;;  %s358_s3 = inlined_call_operand.hbm [shape: f32[2,4], index: 3, kind: output, shape index: {}]  }
   0x1   :  { %9 = vsyncpa [#allocation6], 0 }
   0x2   :  { %10 = vsyncpa [#allocation4], 0  ;;  %s16_s14 = sshll.u32 %s355_s0, 4  ;;  %s320_s15 = smov [#allocation2]   ;;  %s17_s14 = int_to_ptr.hbm [resolvable:$true] %s16_s14 }
   0x3   :  { %s18_s16 = sshll.u32 %s320_s15, 4  ;;  %s27_s19 = sshll.u32 %s356_s1, 4  ;;  %s19_s16 = int_to_ptr.vmem [resolvable:$true] %s18_s16  ;;  %s28_s19 = int_to_ptr.hbm [resolvable:$true] %s27_s19 }
   0x4   :  { %21 = dma.hbm_to_vmem [thread:$0]  %s17_s14, 128, %s19_s16, [#allocation3]  }
   0x5   :  { %s321_s20 = smov [#allocation5]  }
   0x6   :  { %s29_s21 = sshll.u32 %s321_s20, 4  ;;  %s30_s21 = int_to_ptr.vmem [resolvable:$true] %s29_s21 }
   0x7   :  { %32 = dma.hbm_to_vmem [thread:$0]  %s28_s19, 256, %s30_s21, [#allocation6]  }
   0x8   :  { %314 = dma.done.wait [#allocation3], 128  }
   0x9   :  { %315 = vsyncadd [#allocation3], 4294967168 }
   0xa   :  { %316 = dma.done.wait [#allocation6], 256  }
   0xb   :  { %317 = vsyncadd [#allocation6], 4294967040  ;;  %v44_v0 = vld [vmem:[#allocation2] sm:$0xff]  ;;  %v45_v1 = vld [vmem:[#allocation5] sm:$0xff]  ;;  %s222_s25 = sshll.u32 %s358_s3, 4  ;;  %vm213_vm3 = vcmask 25600   ;;  %s223_s25 = int_to_ptr.hbm [resolvable:$true] %s222_s25 }
   0xc   :  { %52 = vst [vmem:[#allocation1] ss:$9 sm:$0xff] %v44_v0  ;;  %v46_v2 = vld [vmem:[#allocation5 + $0x8] sm:$0xff]  ;;  %v237_v19 = vld [vmem:[%s357_s2] ss:$0 sm:$0xff]  ;;  %s322_s2 = smov [#allocation7]  }
   0xd   :  { %s220_s22 = sshll.u32 %s322_s2, 4  ;;  %s221_s22 = int_to_ptr.vmem [resolvable:$true] %s220_s22 }
  0x13   :  { %v53_v3 = vld [vmem:[#allocation1] sm:$0xff]  ;;  %v54_v4 = vld [vmem:[#allocation1 + $0x9] sm:$0xff]  ;;  %v55_v5 = vld [vmem:[#allocation1 + $0x12] sm:$0xff] }
  0x14   :  { %v56_v6 = vld [vmem:[#allocation1 + $0x1b] sm:$0xff]  ;;  %v57_v7 = vld [vmem:[#allocation1 + $0x24] sm:$0xff]  ;;  %v58_v8 = vld [vmem:[#allocation1 + $0x2d] sm:$0xff] }
  0x15   :  { %70 = vst [vmem:[#allocation1] ss:$4 sm:$0xff] %v45_v1  ;;  %v59_v9 = vld [vmem:[#allocation1 + $0x36] sm:$0xff]  ;;  %v60_v18 = vld [vmem:[#allocation1 + $0x3f] sm:$0xff] }
  0x16   :  { %73 = vst [vmem:[#allocation1 + $0x20] ss:$4 sm:$0xff] %v46_v2 }
  0x1c   :  { %v74_v10 = vld.sshfl [vmem:[#allocation1] sm:$0xff pattern:$0x73625140]  ;;  %v75_v11 = vld.sshfl [vmem:[#allocation1 + $0x8] sm:$0xff pattern:$0x73625140] }
  0x1d   :  { %97 = vmatpush.bf16.xpose.msra.mxu0 %v74_v10  ;;  %110 = vmatpush.bf16.xpose.msra.mxu1 %v75_v11  ;;  %v76_v12 = vld.sshfl [vmem:[#allocation1 + $0x10] sm:$0xff pattern:$0x73625140]  ;;  %v77_v13 = vld.sshfl [vmem:[#allocation1 + $0x18] sm:$0xff pattern:$0x73625140] }
  0x1e   :  { %123 = vmatpush.bf16.xpose.msra.mxu2 %v76_v12  ;;  %136 = vmatpush.bf16.xpose.msra.mxu3 %v77_v13  ;;  %v80_v14 = vld.sshfl [vmem:[#allocation1 + $0x30] sm:$0xff pattern:$0x73625140]  ;;  %v78_v15 = vld.sshfl [vmem:[#allocation1 + $0x20] sm:$0xff pattern:$0x73625140] }
  0x1f   :  { %v81_v16 = vld.sshfl [vmem:[#allocation1 + $0x38] sm:$0xff pattern:$0x73625140]  ;;  %v79_v17 = vld.sshfl [vmem:[#allocation1 + $0x28] sm:$0xff pattern:$0x73625140] }
  0x24   :  { %98 = vmatmul.bf16.vlgmr.msra.gmra.mxu0 %v53_v3  ;;  %111 = vmatmul.bf16.vlgmr.msra.gmra.mxu1 %v54_v4 }
  0x25   :  { %149 = vmatpush.bf16.xpose.msrb.mxu0 %v78_v15  ;;  %162 = vmatpush.bf16.xpose.msrb.mxu1 %v79_v17 }
  0x26   :  { %175 = vmatpush.bf16.xpose.msrb.mxu2 %v80_v14  ;;  %188 = vmatpush.bf16.xpose.msrb.mxu3 %v81_v16 }
  0x27   :  { %124 = vmatmul.bf16.vlgmr.msra.gmra.mxu2 %v55_v5  ;;  %137 = vmatmul.bf16.vlgmr.msra.gmra.mxu3 %v56_v6 }
  0x34   :  { %150 = vmatmul.bf16.vlgmr.msrb.gmra.mxu0 %v57_v7  ;;  %163 = vmatmul.bf16.vlgmr.msrb.gmra.mxu1 %v58_v8 }
  0x37   :  { %176 = vmatmul.bf16.vlgmr.msrb.gmra.mxu2 %v59_v9  ;;  %189 = vmatmul.bf16.vlgmr.msrb.gmra.mxu3 %v60_v18 }
  0xa1   :  { %v99_v20 = vpop.f32.mrf.mxu0  ;;  %v112_v21 = vpop.f32.mrf.mxu1 }
  0xa2   :  { %v100_v22 = vadd.f32 %v237_v19, %v99_v20 }
  0xa4   :  { %v113_v25 = vadd.f32 %v112_v21, %v100_v22 }
  0xa9   :  { %v101_v26 = vpop.f32.mrf.mxu0  ;;  %v114_v27 = vpop.f32.mrf.mxu1 }
  0xaa   :  { %v125_v23 = vpop.f32.mrf.mxu2  ;;  %v138_v24 = vpop.f32.mrf.mxu3 }
  0xab   :  { %v126_v28 = vadd.f32 %v125_v23, %v113_v25 }
  0xad   :  { %v139_v31 = vadd.f32 %v138_v24, %v126_v28 }
  0xb1   :  { %v151_v32 = vpop.f32.mrf.mxu0  ;;  %v164_v33 = vpop.f32.mrf.mxu1 }
  0xb2   :  { %v127_v29 = vpop.f32.mrf.mxu2  ;;  %v140_v30 = vpop.f32.mrf.mxu3  ;;  %v152_v34 = vadd.f32 %v151_v32, %v139_v31 }
  0xb4   :  { %v165_v35 = vadd.f32 %v164_v33, %v152_v34 }
  0xb9   :  { %v153_v39 = vpop.f32.mrf.mxu0  ;;  %v166_v40 = vpop.f32.mrf.mxu1 }
  0xba   :  { %v177_v36 = vpop.f32.mrf.mxu2  ;;  %v190_v37 = vpop.f32.mrf.mxu3 }
  0xbb   :  { %v178_v38 = vadd.f32 %v177_v36, %v165_v35 }
  0xbd   :  { %v191_v41 = vadd.f32 %v190_v37, %v178_v38 }
  0xbf   :  { %v233_v42 = vmul.f32 -1.442695, %v191_v41 }
  0xc1   :  { %238 = vpow2.f32 %v233_v42 }
  0xc2   :  { %v179_v43 = vpop.f32.mrf.mxu2  ;;  %v192_v44 = vpop.f32.mrf.mxu3 }
  0xc7   :  { %v239_v45 = vpop.eup %238 }
  0xc8   :  { %v197_v46 = vadd.f32 1.0, %v239_v45 }
  0xca   :  { %240 = vrcp.f32 %v197_v46  ;;  %v209_v50 = vand.u32 2147483648, %v197_v46  ;;  %v207_v52 = vand.u32 2147483647, %v197_v46  ;;  %vm203_vm1 = vweird.f32 %v197_v46 }
  0xcc   :  { %v210_v54 = vor.u32 1.1754944e-38, %v209_v50  ;;  %vm208_vm4 = vcmp.eq.f32.partialorder %v207_v52, 8.507059e+37 }
  0xd0   :  { %v241_v47 = vpop.eup %240 }
  0xd1   :  { %v199_v48 = vmul.f32 %v241_v47, %v197_v46  ;;  %vm204_vm0 = vweird.f32 %v241_v47 }
  0xd2   :  { %vm205_vm2 = vmor %vm203_vm1, %vm204_vm0 }
  0xd3   :  { %v200_v49 = vsub.f32 1.0, %v199_v48 }
  0xd5   :  { %v201_v51 = vmul.f32 %v241_v47, %v200_v49 }
  0xd7   :  { %v202_v53 = vadd.f32 %v241_v47, %v201_v51 }
  0xd9   :  { %v206_v55 = vsel %vm205_vm2, %v241_v47, %v202_v53 }
  0xda   :  { %v211_v56 = vsel %vm208_vm4, %v210_v54, %v206_v55 }
  0xdb   :  { %214 = vst.msk [vmem:[#allocation7] sm:$0x3] %vm213_vm3, %v211_v56 }
  0xdc   :  { %225 = dma.vmem_to_hbm [thread:$0]  %s221_s22, 32, %s223_s25, [#allocation4]  }
  0xdd   :  { %318 = dma.done.wait [#allocation4], 32  }
  0xde   :  { %319 = vsyncadd [#allocation4], 4294967264 }
  0xdf   :  { %230 = vsyncpa [#allocation3], 1 }
  0xe0   :  { %231 = vsyncpa [#allocation6], 1 }
  0xe1   :  { %232 = vsyncpa [#allocation4], 1 }

</bundles_post_ra>
